<compile_context>
chip_gen: v7x
topology: tpu7x:2x2x1
jax: 0.10.0
libtpu: 0.0.40
codegen_flags: <defaults>
</compile_context>

<pallas_src>
import functools

import jax
import jax.numpy as jnp
from jax.experimental import pallas as pl
from jax.experimental.pallas import tpu as pltpu

SIZE_INPUT = 23
SIZE_HIDDEN = 40
SIZE_OUT = 6

IN_PAD = 24    # 23 features + 1 "ones" row (folds the layer-1 bias into W1)
OUT_PAD = 8    # 6 logits padded up to 8 sublanes


def _round_up(n, m):
    return ((n + m - 1) // m) * m


def mlp_kernel(x_ref, w1_ref, w2_ref, b2_ref, w3_ref, b3_ref, o_ref):
    """Feature-major MLP forward. Batch lives on the lane (last) axis.

    x_ref  : [IN_PAD,  TB]  rows 0..22 = features, row 23 = ones (bias trick)
    w1_ref : [40, IN_PAD]   = [W1 | b1]
    w2_ref : [40, 40]       b2_ref : [40, 1]
    w3_ref : [OUT_PAD, 40]  b3_ref : [OUT_PAD, 1]
    o_ref  : [OUT_PAD, TB]
    """
    x = x_ref[...]                                                   # [24, TB]
    h1 = jnp.maximum(
        jnp.dot(w1_ref[...], x, preferred_element_type=jnp.float32), 0.0)
    h2 = jnp.maximum(
        jnp.dot(w2_ref[...], h1, preferred_element_type=jnp.float32)
        + b2_ref[...], 0.0)
    out = (jnp.dot(w3_ref[...], h2, preferred_element_type=jnp.float32)
           + b3_ref[...])
    o_ref[...] = out.astype(o_ref.dtype)                             # [8, TB]


def prepare_params(params):
    """PyTorch-layout params -> padded, kernel-layout params (done once)."""
    w1, b1, w2, b2, w3, b3 = params
    w1a = jnp.concatenate([w1, b1[:, None]], axis=1)                  # [40, 24]
    b2c = b2[:, None]                                                 # [40, 1]
    w3p = jnp.pad(w3, ((0, OUT_PAD - SIZE_OUT), (0, 0)))              # [8, 40]
    b3p = jnp.pad(b3[:, None], ((0, OUT_PAD - SIZE_OUT), (0, 0)))     # [8, 1]
    return w1a, w2, b2c, w3p, b3p


@jax.jit
def net_forward(x, kernel_params):
    """x: [B, 23] float32 -> logits [B, 6] float32."""
    w1a, w2, b2c, w3p, b3p = kernel_params
    B = x.shape[0]

    # Batch tile: lane axis must be a multiple of 128; 512 rows/step keeps the
    # double-buffered x tile (~2*48 KB) + resident weights far under VMEM on
    # all generations (incl. v7x's 64 MiB) while amortizing per-step overhead.
    tb = min(512, _round_up(max(B, 1), 128))
    b_pad = _round_up(B, tb)

    # Lane-dense, feature-major input: append the bias-ones column, zero-pad
    # the batch to a multiple of TB, then transpose -> [24, b_pad].
    x_aug = jnp.concatenate([x, jnp.ones((B, 1), x.dtype)], axis=1)   # [B, 24]
    x_aug = jnp.pad(x_aug, ((0, b_pad - B), (0, 0)))
    x_t = x_aug.T                                                     # [24, b_pad]

    const = lambda shape: pl.BlockSpec(shape, lambda i: (0, 0))

    out_t = pl.pallas_call(
        mlp_kernel,
        out_shape=jax.ShapeDtypeStruct((OUT_PAD, b_pad), jnp.float32),
        grid_spec=pltpu.PrefetchScalarGridSpec(
            num_scalar_prefetch=0,
            grid=(b_pad // tb,),
            in_specs=[
                pl.BlockSpec((IN_PAD, tb), lambda i: (0, i)),  # pipelined x tile
                const(w1a.shape),                              # resident weights
                const(w2.shape),
                const(b2c.shape),
                const(w3p.shape),
                const(b3p.shape),
            ],
            out_specs=pl.BlockSpec((OUT_PAD, tb), lambda i: (0, i)),
        ),
        compiler_params=pltpu.CompilerParams(
            dimension_semantics=("parallel",),   # megacore sharding on v7x
        ),
    )(x_t, w1a, w2, b2c, w3p, b3p)

    # Drop the padded logit rows / padded batch columns, back to [B, 6].
    return out_t[:SIZE_OUT, :B].T


def init_params(key):
    """Deterministic init mimicking nn.Linear: U(-1/sqrt(fan_in), +1/sqrt(fan_in)).

    Weights are kept in PyTorch layout (out_features, in_features)."""
    def linear(key, fan_in, fan_out):
        kw, kb = jax.random.split(key)
        bound = 1.0 / float(fan_in) ** 0.5
        w = jax.random.uniform(kw, (fan_out, fan_in), jnp.float32, -bound, bound)
        b = jax.random.uniform(kb, (fan_out,), jnp.float32, -bound, bound)
        return w, b

    k1, k2, k3 = jax.random.split(key, 3)
    w1, b1 = linear(k1, SIZE_INPUT, SIZE_HIDDEN)
    w2, b2 = linear(k2, SIZE_HIDDEN, SIZE_HIDDEN)
    w3, b3 = linear(k3, SIZE_HIDDEN, SIZE_OUT)
    return (w1, b1, w2, b2, w3, b3)


def net_forward_ref(x, params):
    """Plain-XLA reference in PyTorch semantics (full-precision matmuls)."""
    w1, b1, w2, b2, w3, b3 = params
    hp = jax.lax.Precision.HIGHEST
    h1 = jnp.maximum(jnp.dot(x, w1.T, precision=hp) + b1, 0.0)
    h2 = jnp.maximum(jnp.dot(h1, w2.T, precision=hp) + b2, 0.0)
    return jnp.dot(h2, w3.T, precision=hp) + b3


if __name__ == "__main__":
    key = jax.random.PRNGKey(0)
    k_params, k_x = jax.random.split(key)

    params = init_params(k_params)          # PyTorch-layout params
    kparams = prepare_params(params)        # padded kernel-layout params

    batch = 8
    x = jax.random.normal(k_x, (batch, SIZE_INPUT), jnp.float32)

    out = net_forward(x, kparams)
    out = jax.block_until_ready(out)

    ref = net_forward_ref(x, params)
    assert out.shape == (batch, SIZE_OUT)
    # Tolerance allows for differing accumulation order in the transposed
    # (feature-major) kernel layout vs. the reference; still f32-tight.
    assert jnp.allclose(out, ref, atol=1e-4, rtol=1e-4), "mismatch vs reference"

    print("KERNEL_OK")
</pallas_src>

<mosaic_0001>
module attributes {stable_mosaic.version = 11 : i64} {
  func.func @mlp_kernel(%arg0: i32, %arg1: memref<24x128xf32, #tpu.memory_space<vmem>>, %arg2: memref<40x24xf32, #tpu.memory_space<vmem>>, %arg3: memref<40x40xf32, #tpu.memory_space<vmem>>, %arg4: memref<40x1xf32, #tpu.memory_space<vmem>>, %arg5: memref<8x40xf32, #tpu.memory_space<vmem>>, %arg6: memref<8x1xf32, #tpu.memory_space<vmem>>, %arg7: memref<8x128xf32, #tpu.memory_space<vmem>>) attributes {dimension_semantics = [#tpu.dimension_semantics<parallel>], iteration_bounds = array<i64: 1>, scalar_prefetch = 0 : i64, scratch_operands = 0 : i64, tpu.core_type = #tpu.core_type<tc>, window_params = [{transform_indices = @transform_0, window_bounds = array<i64: 24, 128>}, {pipeline_mode = #tpu.pipeline_mode<synchronous>, transform_indices = @transform_1, window_bounds = array<i64: 40, 24>}, {pipeline_mode = #tpu.pipeline_mode<synchronous>, transform_indices = @transform_2, window_bounds = array<i64: 40, 40>}, {pipeline_mode = #tpu.pipeline_mode<synchronous>, transform_indices = @transform_3, window_bounds = array<i64: 40, 1>}, {pipeline_mode = #tpu.pipeline_mode<synchronous>, transform_indices = @transform_4, window_bounds = array<i64: 8, 40>}, {pipeline_mode = #tpu.pipeline_mode<synchronous>, transform_indices = @transform_5, window_bounds = array<i64: 8, 1>}, {transform_indices = @transform_6, window_bounds = array<i64: 8, 128>}]} {
    %c0 = arith.constant 0 : index
    %c0_0 = arith.constant 0 : index
    %0 = vector.load %arg1[%c0, %c0_0] : memref<24x128xf32, #tpu.memory_space<vmem>>, vector<24x128xf32>
    %c0_1 = arith.constant 0 : index
    %c0_2 = arith.constant 0 : index
    %1 = vector.load %arg2[%c0_1, %c0_2] : memref<40x24xf32, #tpu.memory_space<vmem>>, vector<40x24xf32>
    %cst = arith.constant dense<0.000000e+00> : vector<40x128xf32>
    %2 = tpu.matmul %1, %0, %cst {dimension_numbers = #tpu.dot_dimension_numbers<[1], [0], [0], [1], [0, 0, 1, 1], [], []>} : vector<40x24xf32>, vector<24x128xf32>, vector<40x128xf32> -> vector<40x128xf32>
    %cst_3 = arith.constant 0.000000e+00 : f32
    %3 = vector.broadcast %cst_3 : f32 to vector<40x128xf32>
    %4 = arith.maximumf %2, %3 : vector<40x128xf32>
    %c0_4 = arith.constant 0 : index
    %c0_5 = arith.constant 0 : index
    %5 = vector.load %arg3[%c0_4, %c0_5] : memref<40x40xf32, #tpu.memory_space<vmem>>, vector<40x40xf32>
    %cst_6 = arith.constant dense<0.000000e+00> : vector<40x128xf32>
    %6 = tpu.matmul %5, %4, %cst_6 {dimension_numbers = #tpu.dot_dimension_numbers<[1], [0], [0], [1], [0, 0, 1, 1], [], []>} : vector<40x40xf32>, vector<40x128xf32>, vector<40x128xf32> -> vector<40x128xf32>
    %c0_7 = arith.constant 0 : index
    %c0_8 = arith.constant 0 : index
    %7 = vector.load %arg4[%c0_7, %c0_8] : memref<40x1xf32, #tpu.memory_space<vmem>>, vector<40x1xf32>
    %8 = vector.broadcast %7 : vector<40x1xf32> to vector<40x128xf32>
    %9 = arith.addf %6, %8 : vector<40x128xf32>
    %cst_9 = arith.constant 0.000000e+00 : f32
    %10 = vector.broadcast %cst_9 : f32 to vector<40x128xf32>
    %11 = arith.maximumf %9, %10 : vector<40x128xf32>
    %c0_10 = arith.constant 0 : index
    %c0_11 = arith.constant 0 : index
    %12 = vector.load %arg5[%c0_10, %c0_11] : memref<8x40xf32, #tpu.memory_space<vmem>>, vector<8x40xf32>
    %cst_12 = arith.constant dense<0.000000e+00> : vector<8x128xf32>
    %13 = tpu.matmul %12, %11, %cst_12 {dimension_numbers = #tpu.dot_dimension_numbers<[1], [0], [0], [1], [0, 0, 1, 1], [], []>} : vector<8x40xf32>, vector<40x128xf32>, vector<8x128xf32> -> vector<8x128xf32>
    %c0_13 = arith.constant 0 : index
    %c0_14 = arith.constant 0 : index
    %14 = vector.load %arg6[%c0_13, %c0_14] : memref<8x1xf32, #tpu.memory_space<vmem>>, vector<8x1xf32>
    %15 = vector.broadcast %14 : vector<8x1xf32> to vector<8x128xf32>
    %16 = arith.addf %13, %15 : vector<8x128xf32>
    %c0_15 = arith.constant 0 : index
    %c0_16 = arith.constant 0 : index
    %17 = vector.load %arg7[%c0_15, %c0_16] : memref<8x128xf32, #tpu.memory_space<vmem>>, vector<8x128xf32>
    tpu.vector_store %arg7[%c0_15, %c0_16], %16 {strides = array<i32>} : memref<8x128xf32, #tpu.memory_space<vmem>>, vector<8x128xf32>,
    return
  }
  func.func @transform_0(%arg0: i32) -> (i32, i32) {
    %c0_i32 = arith.constant 0 : i32
    %c0_i32_0 = arith.constant 0 : i32
    return %c0_i32, %arg0 : i32, i32
  }
  func.func @transform_1(%arg0: i32) -> (i32, i32) {
    %c0_i32 = arith.constant 0 : i32
    %c0_i32_0 = arith.constant 0 : i32
    %c0_i32_1 = arith.constant 0 : i32
    return %c0_i32, %c0_i32_0 : i32, i32
  }
  func.func @transform_2(%arg0: i32) -> (i32, i32) {
    %c0_i32 = arith.constant 0 : i32
    %c0_i32_0 = arith.constant 0 : i32
    %c0_i32_1 = arith.constant 0 : i32
    return %c0_i32, %c0_i32_0 : i32, i32
  }
  func.func @transform_3(%arg0: i32) -> (i32, i32) {
    %c0_i32 = arith.constant 0 : i32
    %c0_i32_0 = arith.constant 0 : i32
    %c0_i32_1 = arith.constant 0 : i32
    return %c0_i32, %c0_i32_0 : i32, i32
  }
  func.func @transform_4(%arg0: i32) -> (i32, i32) {
    %c0_i32 = arith.constant 0 : i32
    %c0_i32_0 = arith.constant 0 : i32
    %c0_i32_1 = arith.constant 0 : i32
    return %c0_i32, %c0_i32_0 : i32, i32
  }
  func.func @transform_5(%arg0: i32) -> (i32, i32) {
    %c0_i32 = arith.constant 0 : i32
    %c0_i32_0 = arith.constant 0 : i32
    %c0_i32_1 = arith.constant 0 : i32
    return %c0_i32, %c0_i32_0 : i32, i32
  }
  func.func @transform_6(%arg0: i32) -> (i32, i32) {
    %c0_i32 = arith.constant 0 : i32
    %c0_i32_0 = arith.constant 0 : i32
    return %c0_i32, %arg0 : i32, i32
  }
}

</mosaic_0001>

<bundles_post_ra>
// kernel: net_forward.1
= control target key start
LH: loop header
LB: loop body
LE: loop exit
PB: predicated region body
PF: predicated region fallthrough
CT: control target
= control target key end

     0   :  { %v488_v0 = vmov 0.0|0.0   ;;  %vm489_vm0 = vmmov 0   ;;  %v490_v3 = vmov 0.0   ;;  %vm31_vm1 = vcmask 195584   ;;  %s626_s0 = inlined_call_operand.vmem [shape: f32[24,128], index: 0, kind: input, shape index: {}]   ;;  %s627_s1 = inlined_call_operand.vmem [shape: f32[40,24], index: 1, kind: input, shape index: {}]   ;;  %s628_s3 = inlined_call_operand.vmem [shape: f32[40,1], index: 3, kind: input, shape index: {}]   ;;  %s629_s5 = inlined_call_operand.vmem [shape: f32[8,1], index: 5, kind: input, shape index: {}]   ;;  %s630_s2 = inlined_call_operand.vmem [shape: f32[40,40], index: 2, kind: input, shape index: {}]   ;;  %s631_s4 = inlined_call_operand.vmem [shape: f32[8,40], index: 4, kind: input, shape index: {}]   ;;  %s632_s6 = inlined_call_operand.vmem [shape: f32[8,128], index: 6, kind: output, shape index: {}]  }
   0x1   :  { %467 = vmatprep.subr.bf16.mxu0 %v488_v0  ;;  %v23_v1 = vld [vmem:[%s626_s0] sm:$0xff]  ;;  %v24_v2 = vld [vmem:[%s626_s0 + $0x8] sm:$0xff]  ;;  %414 = vmatprep.mubr.msk.f32.mxu0 %vm489_vm0, %v490_v3  ;;  %v25_v5 = vld [vmem:[%s626_s0 + $0x10] sm:$0xff]  ;;  %v491_v11 = vmov 0   ;;  %vm177_vm2 = vcmask 326656  }
   0x2   :  { %v468_v4 = vpack.c.bf16 %v24_v2, %v23_v1  ;;  %470 = vmatprep.subr.bf16.mxu1 %v488_v0  ;;  %439 = vmatprep.mubr.msk.f32.mxu1 %vm489_vm0, %v490_v3  ;;  %v26_v6 = vld [vmem:[%s627_s1] sm:$0xff]  ;;  %v27_v7 = vld [vmem:[%s627_s1 + $0x8] sm:$0xff]  ;;  %v28_v8 = vld [vmem:[%s627_s1 + $0x10] sm:$0xff] }
   0x3   :  { %v29_v9 = vld [vmem:[%s627_s1 + $0x18] sm:$0xff]  ;;  %v30_v10 = vld [vmem:[%s627_s1 + $0x20] sm:$0xff]  ;;  %486 = vset.pattern.permute.xlu0 %v491_v11  ;;  %487 = vset.pattern.permute.xlu1 %v491_v11  ;;  %v149_v13 = vld [vmem:[%s628_s3 + $0x10] sm:$0xff] }
   0x4   :  { %469 = vmatpush3.bf16.msra.mxu0 %v468_v4  ;;  %v147_v12 = vld [vmem:[%s628_s3] sm:$0xff]  ;;  %164 = vperm.xlu1 %487, %v149_v13   ;;  %v148_v14 = vld [vmem:[%s628_s3 + $0x8] sm:$0xff]  ;;  %v150_v15 = vld [vmem:[%s628_s3 + $0x18] sm:$0xff] }
   0x5   :  { %412 = vmatprep.subr.mxu0 %v490_v3  ;;  %154 = vperm.xlu0 %486, %v147_v12   ;;  %v151_v16 = vld [vmem:[%s628_s3 + $0x20] sm:$0xff]  ;;  %v143_v36 = vld [vmem:[%s630_s2 + $0x8] sm:$0xff]  ;;  %v144_v37 = vld [vmem:[%s630_s2 + $0x10] sm:$0xff] }
   0x6   :  { %v289_v17 = vld [vmem:[%s629_s5] sm:$0xff]  ;;  %v145_v38 = vld [vmem:[%s630_s2 + $0x18] sm:$0xff] }
   0x7   :  { %v142_v35 = vld [vmem:[%s630_s2] sm:$0xff] }
   0x8   :  { %413 = vmatpush3.msra.mxu0 %v25_v5  ;;  %169 = vperm.xlu1 %487, %v150_v15   ;;  %v146_v39 = vld [vmem:[%s630_s2 + $0x20] sm:$0xff] }
   0x9   :  { %415 = vmatmul.mubr.msk.f32.vlgmr.msra.gmra.mrb[0].mxu0 %vm31_vm1, %v26_v6  ;;  %476 = vmatprep.subr.bf16.mxu0 %v488_v0  ;;  %v288_v5 = vld [vmem:[%s631_s4] sm:$0xff] }
   0xa   :  { %417 = vmatprep.mubr.msk.f32.mxu0 %vm489_vm0, %v490_v3  ;;  %159 = vperm.xlu0 %486, %v148_v14  }
   0xc   :  { %292 = vperm.xlu1 %487, %v289_v17  }
   0xd   :  { %418 = vmatmul.mubr.msk.f32.gmra.mrb[2].mxu0 %vm31_vm1, %v27_v7 }
   0xe   :  { %420 = vmatprep.mubr.msk.f32.mxu0 %vm489_vm0, %v490_v3  ;;  %174 = vperm.xlu0 %486, %v151_v16  }
  0x11   :  { %421 = vmatmul.mubr.msk.f32.gmra.mrb[4].mxu0 %vm31_vm1, %v28_v8 }
  0x12   :  { %423 = vmatprep.mubr.msk.f32.mxu0 %vm489_vm0, %v490_v3 }
  0x15   :  { %424 = vmatmul.mubr.msk.f32.gmra.mrb[6].mxu0 %vm31_vm1, %v29_v9 }
  0x16   :  { %426 = vmatprep.mubr.msk.f32.mxu0 %vm489_vm0, %v490_v3 }
  0x19   :  { %427 = vmatmul.mubr.msk.f32.gmra.mrb[8].mxu0 %vm31_vm1, %v30_v10 }
  0x1a   :  { %464 = vmatprep.mubr.msk.f32.mxu0 %vm489_vm0, %v490_v3 }
  0x83   :  { %v165_v48 = vpop.permute.xlu1 %164 }
  0x84   :  { %v155_v40 = vpop.permute.xlu0 %154 }
  0x87   :  { %v170_v55 = vpop.permute.xlu1 %169 }
  0x89   :  { %v160_v44 = vpop.permute.xlu0 %159 }
  0x8d   :  { %v175_v61 = vpop.permute.xlu0 %174 }
  0xdc   :  { %v113_v18 = vpop.f32.mrb[0].mxu0 }
  0xdd   :  { %v416_v19 = vpop.f32.mrb[1].mxu0  ;;  %v137_v21 = vmax.f32 %v113_v18, 0.0 }
  0xe0   :  { %v118_v20 = vpop.f32.mrb[2].mxu0 }
  0xe1   :  { %v138_v22 = vmax.f32 %v118_v20, 0.0  ;;  %v419_v23 = vpop.f32.mrb[3].mxu0 }
  0xe3   :  { %v471_v24 = vpack.c.bf16 %v138_v22, %v137_v21 }
  0xe4   :  { %v123_v25 = vpop.f32.mrb[4].mxu0 }
  0xe5   :  { %v422_v26 = vpop.f32.mrb[5].mxu0  ;;  %472 = vmatpush3.bf16.msra.mxu1 %v471_v24  ;;  %v139_v28 = vmax.f32 %v123_v25, 0.0 }
  0xe6   :  { %473 = vmatprep.subr.bf16.mxu1 %v488_v0 }
  0xe8   :  { %v128_v27 = vpop.f32.mrb[6].mxu0 }
  0xe9   :  { %v140_v29 = vmax.f32 %v128_v27, 0.0  ;;  %v425_v30 = vpop.f32.mrb[7].mxu0 }
  0xeb   :  { %v474_v31 = vpack.c.bf16 %v140_v29, %v139_v28 }
  0xec   :  { %v133_v32 = vpop.f32.mrb[8].mxu0 }
  0xed   :  { %v141_v33 = vmax.f32 %v133_v32, 0.0  ;;  %475 = vmatpush3.bf16.msra.mxu1 %v474_v31  ;;  %v428_v34 = vpop.f32.mrb[9].mxu0 }
  0xee   :  { %437 = vmatprep.subr.mxu1 %v490_v3 }
  0xf1   :  { %438 = vmatpush3.msra.mxu1 %v141_v33 }
  0xf2   :  { %440 = vmatmul.mubr.msk.f32.vlgmr.msra.gmra.mrb[0].mxu1 %vm177_vm2, %v142_v35 }
  0xf3   :  { %442 = vmatprep.mubr.msk.f32.mxu1 %vm489_vm0, %v490_v3 }
  0xf6   :  { %443 = vmatmul.mubr.msk.f32.gmra.mrb[2].mxu1 %vm177_vm2, %v143_v36 }
  0xf7   :  { %445 = vmatprep.mubr.msk.f32.mxu1 %vm489_vm0, %v490_v3 }
  0xfa   :  { %446 = vmatmul.mubr.msk.f32.gmra.mrb[4].mxu1 %vm177_vm2, %v144_v37 }
  0xfb   :  { %448 = vmatprep.mubr.msk.f32.mxu1 %vm489_vm0, %v490_v3 }
  0xfe   :  { %449 = vmatmul.mubr.msk.f32.gmra.mrb[6].mxu1 %vm177_vm2, %v145_v38 }
  0xff   :  { %451 = vmatprep.mubr.msk.f32.mxu1 %vm489_vm0, %v490_v3 }
 0x102   :  { %452 = vmatmul.mubr.msk.f32.gmra.mrb[8].mxu1 %vm177_vm2, %v146_v39 }
 0x1c5   :  { %v259_v41 = vpop.f32.mrb[0].mxu1 }
 0x1c6   :  { %v441_v42 = vpop.f32.mrb[1].mxu1  ;;  %v260_v43 = vadd.f32 %v259_v41, %v155_v40 }
 0x1c8   :  { %v283_v49 = vmax.f32 %v260_v43, 0.0 }
 0x1c9   :  { %v264_v45 = vpop.f32.mrb[2].mxu1 }
 0x1ca   :  { %v265_v46 = vadd.f32 %v264_v45, %v160_v44  ;;  %v444_v47 = vpop.f32.mrb[3].mxu1 }
 0x1cc   :  { %v284_v50 = vmax.f32 %v265_v46, 0.0 }
 0x1cd   :  { %v269_v51 = vpop.f32.mrb[4].mxu1 }
 0x1ce   :  { %v477_v52 = vpack.c.bf16 %v284_v50, %v283_v49  ;;  %v447_v53 = vpop.f32.mrb[5].mxu1  ;;  %v270_v54 = vadd.f32 %v269_v51, %v165_v48 }
 0x1d0   :  { %478 = vmatpush3.bf16.msra.mxu0 %v477_v52  ;;  %v285_v59 = vmax.f32 %v270_v54, 0.0 }
 0x1d1   :  { %v274_v56 = vpop.f32.mrb[6].mxu1  ;;  %479 = vmatprep.subr.bf16.mxu0 %v488_v0  ;;  %v293_v0 = vpop.permute.xlu1 %292 }
 0x1d2   :  { %v275_v57 = vadd.f32 %v274_v56, %v170_v55  ;;  %v450_v58 = vpop.f32.mrb[7].mxu1 }
 0x1d4   :  { %v286_v60 = vmax.f32 %v275_v57, 0.0 }
 0x1d5   :  { %v279_v62 = vpop.f32.mrb[8].mxu1 }
 0x1d6   :  { %v480_v63 = vpack.c.bf16 %v286_v60, %v285_v59  ;;  %v280_v1 = vadd.f32 %v279_v62, %v175_v61  ;;  %v453_v2 = vpop.f32.mrb[9].mxu1 }
 0x1d8   :  { %481 = vmatpush3.bf16.msra.mxu0 %v480_v63  ;;  %v287_v4 = vmax.f32 %v280_v1, 0.0 }
 0x1d9   :  { %462 = vmatprep.subr.mxu0 %v490_v3 }
 0x1dc   :  { %463 = vmatpush3.msra.mxu0 %v287_v4 }
 0x1dd   :  { %465 = vmatmul.mubr.msk.f32.vlgmr.msra.gmra.mrb[10].mxu0 %vm177_vm2, %v288_v5 }
 0x2b0   :  { %v364_v6 = vpop.f32.mrb[10].mxu0 }
 0x2b1   :  { %v365_v7 = vadd.f32 %v364_v6, %v293_v0  ;;  %v466_v8 = vpop.f32.mrb[11].mxu0 }
 0x2b3   :  { %368 = vst [vmem:[%s632_s6] sm:$0xff] %v365_v7 }

</bundles_post_ra>
